<compile_context>
chip_gen: v7x
topology: tpu7x:2x2x1
jax: 0.10.0
libtpu: 0.0.40
codegen_flags: <defaults>
</compile_context>

<pallas_src>
import jax
import jax.numpy as jnp
from jax.experimental import pallas as pl
from jax.experimental.pallas import tpu as pltpu

_EPS = 1e-6
_LANE = 128       # lane (fast) axis width
_TR_MAX = 2048    # rows per grid step -> 2048*128*4 B = 1 MiB payload per block


def _variation_set_kernel(w_ref, pts_ref, out_ref):
    # pts_ref: (TR, 128) f32, interleaved point stream: x at even lanes, y at odd lanes.
    v = pts_ref[...]
    rows, lanes = v.shape

    lane_idx = jax.lax.broadcasted_iota(jnp.int32, (rows, lanes), 1)
    is_even = (lane_idx & 1) == 0                      # True at x lanes

    # Neighbor-pair swap (partner[i] = v[i ^ 1]) via XLU lane rotations:
    #   roll by (lanes-1)  ==  roll by -1  -> result[i] = v[i+1]
    #   roll by 1                          -> result[i] = v[i-1]
    nxt = pltpu.roll(v, lanes - 1, 1)
    prv = pltpu.roll(v, 1, 1)
    partner = jnp.where(is_even, nxt, prv)             # y at x-lanes, x at y-lanes

    r2 = v * v + partner * partner + _EPS
    inv_r2 = pl.reciprocal(r2, approx=True)
    inv_r2 = inv_r2 * (2.0 - r2 * inv_r2)              # 1 Newton-Raphson step (EUP -> VPU fixup)
    sin_r2 = jnp.sin(r2)
    cos_r2 = jnp.cos(r2)

    # swirl: x-lanes -> x sin(r2) - y cos(r2);  y-lanes -> y sin(r2) + x cos(r2)
    sign = jnp.where(is_even, -1.0, 1.0).astype(v.dtype)
    swirl = v * sin_r2 + sign * (partner * cos_r2)

    w_lin = w_ref[0]
    w_sin = w_ref[1]
    w_sph = w_ref[2]
    w_swl = w_ref[3]

    out_ref[...] = (w_lin * v
                    + w_sin * jnp.sin(v)
                    + w_sph * (v * inv_r2)
                    + w_swl * swirl)


def variation_set(points, weights):
    """points: (N, 2) float, weights: (4,) float (unnormalized). Returns (N, 2) f32."""
    n = points.shape[0]
    w = (weights / weights.sum()).astype(jnp.float32)

    # Free reshape: row-major (N, 2) -> flat interleaved stream (2N,)
    flat = points.astype(jnp.float32).reshape(-1)
    total = flat.shape[0]
    rows = -(-total // _LANE)                          # ceil(2N / 128)

    if rows <= _TR_MAX:
        tr = max(8, ((rows + 7) // 8) * 8)             # single block, sublane-aligned
    else:
        tr = _TR_MAX
    padded_rows = ((rows + tr - 1) // tr) * tr
    padded_total = padded_rows * _LANE
    if padded_total != total:
        flat = jnp.pad(flat, (0, padded_total - total))
    pts2d = flat.reshape(padded_rows, _LANE)

    out2d = pl.pallas_call(
        _variation_set_kernel,
        out_shape=jax.ShapeDtypeStruct((padded_rows, _LANE), jnp.float32),
        grid_spec=pltpu.PrefetchScalarGridSpec(
            num_scalar_prefetch=0,
            grid=(padded_rows // tr,),
            in_specs=[
                pl.BlockSpec(memory_space=pltpu.MemorySpace.SMEM),  # weights (4,)
                pl.BlockSpec((tr, _LANE), lambda i: (i, 0)),        # point slab
            ],
            out_specs=pl.BlockSpec((tr, _LANE), lambda i: (i, 0)),
        ),
        compiler_params=pltpu.CompilerParams(
            dimension_semantics=("parallel",)),
    )(w, pts2d)

    out_flat = out2d.reshape(-1)
    if padded_total != total:
        out_flat = out_flat[:total]
    return out_flat.reshape(n, 2)


def _reference(points, weights):
    """Pure-JAX reference mirroring the PyTorch VariationSet.forward semantics."""
    w = weights / weights.sum()
    x = points[:, 0]
    y = points[:, 1]
    r2 = x * x + y * y + _EPS
    variations = jnp.stack([
        jnp.stack([x, y], axis=-1),                                        # linear
        jnp.stack([jnp.sin(x), jnp.sin(y)], axis=-1),                      # sinusoidal
        jnp.stack([x / r2, y / r2], axis=-1),                              # spherical
        jnp.stack([x * jnp.sin(r2) - y * jnp.cos(r2),
                   x * jnp.cos(r2) + y * jnp.sin(r2)], axis=-1),           # swirl
    ], axis=0)                                                             # (V, N, 2)
    return jnp.sum(variations * w.reshape(-1, 1, 1), axis=0)               # (N, 2)


if __name__ == "__main__":
    key = jax.random.PRNGKey(0)
    weights = jnp.array([1.0, 2.0, 3.0, 4.0], dtype=jnp.float32)

    # Aligned case
    n_points = 256
    points = jax.random.normal(key, (n_points, 2), dtype=jnp.float32)
    out = jax.block_until_ready(variation_set(points, weights))
    ref = _reference(points, weights)
    assert out.shape == (n_points, 2)
    assert jnp.allclose(out, ref, atol=1e-5, rtol=1e-5), "mismatch vs reference (aligned)"

    # Ragged case (exercises the padding path)
    n_ragged = 50
    points_r = jax.random.normal(jax.random.PRNGKey(1), (n_ragged, 2), dtype=jnp.float32)
    out_r = jax.block_until_ready(variation_set(points_r, weights))
    ref_r = _reference(points_r, weights)
    assert out_r.shape == (n_ragged, 2)
    assert jnp.allclose(out_r, ref_r, atol=1e-5, rtol=1e-5), "mismatch vs reference (ragged)"

    print("KERNEL_OK")
</pallas_src>

<mosaic_0001>
module attributes {stable_mosaic.version = 11 : i64} {
  func.func @_variation_set_kernel(%arg0: i32, %arg1: memref<4xf32, #tpu.memory_space<smem>>, %arg2: memref<8x128xf32, #tpu.memory_space<vmem>>, %arg3: memref<8x128xf32, #tpu.memory_space<vmem>>) attributes {dimension_semantics = [#tpu.dimension_semantics<parallel>], iteration_bounds = array<i64: 1>, scalar_prefetch = 0 : i64, scratch_operands = 0 : i64, tpu.core_type = #tpu.core_type<tc>, window_params = [{transform_indices = @transform_0, window_bounds = array<i64: 4>}, {transform_indices = @transform_1, window_bounds = array<i64: 8, 128>}, {transform_indices = @transform_2, window_bounds = array<i64: 8, 128>}]} {
    %c0 = arith.constant 0 : index
    %c0_0 = arith.constant 0 : index
    %0 = vector.load %arg2[%c0, %c0_0] : memref<8x128xf32, #tpu.memory_space<vmem>>, vector<8x128xf32>
    %1 = tpu.iota {dimensions = array<i32: 1>} : vector<8x128xi32>
    %c1_i32 = arith.constant 1 : i32
    %2 = vector.broadcast %c1_i32 : i32 to vector<8x128xi32>
    %3 = arith.andi %1, %2 : vector<8x128xi32>
    %c0_i32 = arith.constant 0 : i32
    %4 = vector.broadcast %c0_i32 : i32 to vector<8x128xi32>
    %5 = arith.cmpi eq, %3, %4 : vector<8x128xi32>
    %c127_i32 = arith.constant 127 : i32
    %6 = tpu.dynamic_rotate %0 by %c127_i32 dim 1 : vector<8x128xf32>, i32 -> vector<8x128xf32>
    %c1_i32_1 = arith.constant 1 : i32
    %7 = tpu.dynamic_rotate %0 by %c1_i32_1 dim 1 : vector<8x128xf32>, i32 -> vector<8x128xf32>
    %8 = arith.select %5, %6, %7 : vector<8x128xi1>, vector<8x128xf32>
    %9 = arith.mulf %0, %0 : vector<8x128xf32>
    %10 = arith.mulf %8, %8 : vector<8x128xf32>
    %11 = arith.addf %9, %10 : vector<8x128xf32>
    %cst = arith.constant 9.99999997E-7 : f32
    %12 = vector.broadcast %cst : f32 to vector<8x128xf32>
    %13 = arith.addf %11, %12 : vector<8x128xf32>
    %14 = tpu.reciprocal %13 {approx = true} : vector<8x128xf32> -> vector<8x128xf32>
    %15 = arith.mulf %13, %14 : vector<8x128xf32>
    %cst_2 = arith.constant 2.000000e+00 : f32
    %16 = vector.broadcast %cst_2 : f32 to vector<8x128xf32>
    %17 = arith.subf %16, %15 : vector<8x128xf32>
    %18 = arith.mulf %14, %17 : vector<8x128xf32>
    %19 = math.sin %13 : vector<8x128xf32>
    %20 = math.cos %13 : vector<8x128xf32>
    %cst_3 = arith.constant -1.000000e+00 : f32
    %cst_4 = arith.constant 1.000000e+00 : f32
    %21 = vector.broadcast %cst_3 : f32 to vector<8x128xf32>
    %22 = vector.broadcast %cst_4 : f32 to vector<8x128xf32>
    %23 = arith.select %5, %21, %22 : vector<8x128xi1>, vector<8x128xf32>
    %24 = arith.mulf %0, %19 : vector<8x128xf32>
    %25 = arith.mulf %8, %20 : vector<8x128xf32>
    %26 = arith.mulf %23, %25 : vector<8x128xf32>
    %27 = arith.addf %24, %26 : vector<8x128xf32>
    %c0_5 = arith.constant 0 : index
    %28 = memref.load %arg1[%c0_5] : memref<4xf32, #tpu.memory_space<smem>>
    %c1 = arith.constant 1 : index
    %29 = memref.load %arg1[%c1] : memref<4xf32, #tpu.memory_space<smem>>
    %c2 = arith.constant 2 : index
    %30 = memref.load %arg1[%c2] : memref<4xf32, #tpu.memory_space<smem>>
    %c3 = arith.constant 3 : index
    %31 = memref.load %arg1[%c3] : memref<4xf32, #tpu.memory_space<smem>>
    %32 = vector.broadcast %28 : f32 to vector<8x128xf32>
    %33 = arith.mulf %32, %0 : vector<8x128xf32>
    %34 = math.sin %0 : vector<8x128xf32>
    %35 = vector.broadcast %29 : f32 to vector<8x128xf32>
    %36 = arith.mulf %35, %34 : vector<8x128xf32>
    %37 = arith.addf %33, %36 : vector<8x128xf32>
    %38 = arith.mulf %0, %18 : vector<8x128xf32>
    %39 = vector.broadcast %30 : f32 to vector<8x128xf32>
    %40 = arith.mulf %39, %38 : vector<8x128xf32>
    %41 = arith.addf %37, %40 : vector<8x128xf32>
    %42 = vector.broadcast %31 : f32 to vector<8x128xf32>
    %43 = arith.mulf %42, %27 : vector<8x128xf32>
    %44 = arith.addf %41, %43 : vector<8x128xf32>
    %c0_6 = arith.constant 0 : index
    %c0_7 = arith.constant 0 : index
    %45 = vector.load %arg3[%c0_6, %c0_7] : memref<8x128xf32, #tpu.memory_space<vmem>>, vector<8x128xf32>
    tpu.vector_store %arg3[%c0_6, %c0_7], %44 {strides = array<i32>} : memref<8x128xf32, #tpu.memory_space<vmem>>, vector<8x128xf32>,
    return
  }
  func.func @transform_0(%arg0: i32) -> i32 {
    %c0_i32 = arith.constant 0 : i32
    %c0_i32_0 = arith.constant 0 : i32
    return %c0_i32 : i32
  }
  func.func @transform_1(%arg0: i32) -> (i32, i32) {
    %c0_i32 = arith.constant 0 : i32
    %c0_i32_0 = arith.constant 0 : i32
    return %arg0, %c0_i32 : i32, i32
  }
  func.func @transform_2(%arg0: i32) -> (i32, i32) {
    %c0_i32 = arith.constant 0 : i32
    %c0_i32_0 = arith.constant 0 : i32
    return %arg0, %c0_i32 : i32, i32
  }
}

</mosaic_0001>

<bundles_post_ra>
// kernel: tpu_custom_call.1
= control target key start
LH: loop header
LB: loop body
LE: loop exit
PB: predicated region body
PF: predicated region fallthrough
CT: control target
= control target key end

     0   :  { %7 = vsyncpa [#allocation5], 0  ;;  %s689_s0 = inlined_call_operand.hbm [shape: f32[4], index: 0, kind: input, shape index: {}]   ;;  %s690_s1 = inlined_call_operand.hbm [shape: f32[8,128], index: 1, kind: input, shape index: {}]   ;;  %s691_s2 = inlined_call_operand.hbm [shape: f32[8,128], index: 2, kind: output, shape index: {}]  }
   0x1   :  { %8 = vsyncpa [#allocation3], 0 }
   0x2   :  { %9 = vsyncpa [#allocation4], 0  ;;  %s447_s11 = scalar_lea.hbm %s689_s0, 16 }
   0x3   :  { %p448_p0 = scmp.ne.s32.totalorder %s689_s0, %s447_s11  ;;  %p451_p1 = scmp.lt.u32.totalorder %s447_s11, %s689_s0 }
   0x5   :  { %p453_p2 = pnand %p451_p1, %p448_p0 }
   0x7   :  { %456 = shalt.err (!%p453_p2)
}
   0x8   :  { %s507_s16 = smov [#allocation2]   ;;  %s508_s19 = smov [#allocation6]  }
   0x9   :  { %17 = dma.hbm_to_smem %s689_s0, 16, %s507_s16, [#allocation5]  }
   0xa   :  { %s24_s20 = sshll.u32 %s508_s19, 4  ;;  %s457_s23 = scalar_lea.hbm %s690_s1, 128  ;;  %s25_s20 = int_to_ptr.vmem [resolvable:$true] %s24_s20 }
   0xb   :  { %p458_p3 = scmp.ne.s32.totalorder %s690_s1, %s457_s23  ;;  %p461_p4 = scmp.lt.u32.totalorder %s457_s23, %s690_s1 }
   0xd   :  { %p463_p5 = pnand %p461_p4, %p458_p3 }
   0xf   :  { %466 = shalt.err (!%p463_p5)
}
  0x10   :  { %s467_s28 = scalar_lea.vmem %s25_s20, 128  ;;  %p472_p7 = scmp.lt.s32.totalorder %s25_s20, %s25_s20 }
  0x11   :  { %p468_p6 = scmp.ne.s32.totalorder %s25_s20, %s467_s28  ;;  %p473_p8 = scmp.lt.s32.totalorder %s467_s28, %s467_s28 }
  0x13   :  { %p474_p9 = por %p473_p8, %p472_p7 }
  0x15   :  { %p475_p10 = pnand %p474_p9, %p468_p6 }
  0x17   :  { %478 = shalt.err (!%p475_p10)
}
  0x18   :  { %27 = dma.hbm_to_vmem [thread:$0]  %s690_s1, 128, %s25_s20, [#allocation3]  }
  0x19   :  { %501 = dma.done.wait [#allocation5], 16  }
  0x1a   :  { %502 = vsyncadd [#allocation5], 4294967280 }
  0x1b   :  { %503 = dma.done.wait [#allocation3], 128  }
  0x1c   :  { %504 = vsyncadd [#allocation3], 4294967168 }
  0x1d   :  { %34 = sfence }
  0x1e   :  { %v558_v0 = vld [vmem:[#allocation6] sm:$0xff]  ;;  %s509_s30 = smov 127   ;;  %s510_s3 = smov 1   ;;  %v511_v8 = vmov 2102212464   ;;  %v36_v56 = vlaneseq }
  0x1f   :  { %40 = vrot.lane.b32.xlu0 %v558_v0, %s509_s30  ;;  %v274_v1 = vand.u32 2139095040, %v558_v0  ;;  %v512_v10 = vmov 920167782   ;;  %v513_v12 = vmov 1326507024   ;;  %vm273_vm14 = vcmp.lt.s32.totalorder %v558_v0, 0 }
  0x20   :  { %v271_v14 = vand.u32 2147483647, %v558_v0  ;;  %v514_v17 = vmov 683565275   ;;  %v515_v19 = vmov 2475754826  }
  0x21   :  { %v275_v2 = vshrl.u32 %v274_v1, 23  ;;  %v516_v22 = vmov 2131351028   ;;  %v37_v58 = vand.u32 127, %v36_v56  ;;  %s265_s1 = sld [smem:[#allocation2]]  ;;  %s410_s4 = sld [smem:[#allocation2 + $0x1]] }
  0x22   :  { %v278_v27 = vand.u32 8388607, %v271_v14  ;;  %vm648_vm15 = vcmp.le.f32.partialorder %v271_v14, 0.7853982  ;;  %s667_s5 = sld [smem:[#allocation2 + $0x2]]  ;;  %s412_s6 = sld [smem:[#allocation2 + $0x3]] }
  0x23   :  { %42 = vrot.lane.b32.xlu0 %v558_v0, %s510_s3  ;;  %v413_v3 = vadd.s32 4294967169, %v275_v2  ;;  %v38_v60 = vand.u32 1, %v37_v58  ;;  %s518_s7 = smov [#allocation7]  }
  0x24   :  { %v279_v33 = vor.u32 8388608, %v278_v27  ;;  %s392_s8 = sshll.u32 %s518_s7, 4  ;;  %s393_s8 = int_to_ptr.vmem [resolvable:$true] %s392_s8 }
  0x25   :  { %v281_v4 = vadd.s32 1, %v413_v3  ;;  %vm603_vm6 = vcmp.eq.s32.totalorder %v38_v60, 0  ;;  %v45_v3 = vmul.f32 %v558_v0, %v558_v0  ;;  %s479_s9 = scalar_lea.vmem %s393_s8, 128  ;;  %p484_p12 = scmp.lt.s32.totalorder %s393_s8, %s393_s8 }
  0x26   :  { %v319_v39 = vshll.u32 %v279_v33, 8  ;;  %p480_p11 = scmp.ne.s32.totalorder %s393_s8, %s479_s9  ;;  %p485_p13 = scmp.lt.s32.totalorder %s479_s9, %s479_s9 }
  0x27   :  { %vm282_vm0 = vcmp.gt.s32.totalorder %v281_v4, 0 }
  0x28   :  { %v283_v5 = vsel %vm282_vm0, %v281_v4, 0  ;;  %p486_p0 = por %p485_p13, %p484_p12 }
  0x29   :  { %v285_v6 = vand.u32 31, %v283_v5  ;;  %v284_v15 = vshrl.u32 %v283_v5, 5 }
  0x2a   :  { %p487_p1 = pnand %p486_p0, %p480_p11 }
  0x2b   :  { %v286_v7 = vsub.s32 32, %v285_v6  ;;  %v297_v9 = vshll.u32 %v511_v8, %v285_v6  ;;  %v300_v16 = vshll.u32 %v512_v10, %v285_v6  ;;  %v288_v18 = vshll.u32 %v514_v17, %v285_v6 }
  0x2c   :  { %v291_v20 = vshll.u32 %v515_v19, %v285_v6  ;;  %v294_v24 = vshll.u32 %v516_v22, %v285_v6  ;;  %vm306_vm1 = vcmp.lt.s32.totalorder %v284_v15, 4  ;;  %vm303_vm2 = vcmp.lt.s32.totalorder %v284_v15, 1 }
  0x2d   :  { %v298_v11 = vshrl.u32 %v512_v10, %v286_v7  ;;  %v301_v13 = vshrl.u32 %v513_v12, %v286_v7  ;;  %v289_v21 = vshrl.u32 %v515_v19, %v286_v7  ;;  %v292_v23 = vshrl.u32 %v516_v22, %v286_v7 }
  0x2e   :  { %v295_v25 = vshrl.u32 %v511_v8, %v286_v7  ;;  %vm305_vm3 = vcmp.lt.s32.totalorder %v284_v15, 3  ;;  %vm304_vm4 = vcmp.lt.s32.totalorder %v284_v15, 2  ;;  %v287_v44 = vshrl.u32 %v514_v17, %v286_v7 }
  0x2f   :  { %v299_v26 = vor.u32 %v298_v11, %v297_v9  ;;  %v302_v28 = vor.u32 %v301_v13, %v300_v16  ;;  %v290_v29 = vor.u32 %v289_v21, %v288_v18  ;;  %v293_v30 = vor.u32 %v292_v23, %v291_v20 }
  0x30   :  { %v296_v31 = vor.u32 %v295_v25, %v294_v24 }
  0x31   :  { %v312_v32 = vsel %vm306_vm1, %v299_v26, 920167782  ;;  %v316_v34 = vsel %vm306_vm1, %v302_v28, 1326507024  ;;  %v311_v35 = vsel %vm303_vm2, %v290_v29, %v293_v30  ;;  %v307_v48 = vsel %vm303_vm2, %v287_v44, %v290_v29 }
  0x32   :  { %v313_v36 = vsel %vm305_vm3, %v296_v31, %v312_v32  ;;  %v315_v37 = vsel %vm303_vm2, %v293_v30, %v296_v31  ;;  %v317_v38 = vsel %vm305_vm3, %v299_v26, %v316_v34  ;;  %v308_v47 = vsel %vm306_vm1, %v296_v31, 2102212464 }
  0x33   :  { %v314_v40 = vsel %vm304_vm4, %v311_v35, %v313_v36  ;;  %v318_v41 = vsel %vm304_vm4, %v315_v37, %v317_v38  ;;  %v309_v49 = vsel %vm305_vm3, %v293_v30, %v308_v47 }
  0x34   :  { %v584_v42 = vmul.u32.u64.low %v319_v39, %v314_v40  ;;  %v585_v43 = vmul.u32.u64.high %v319_v39, %v314_v40, %v584_v42  ;;  %v588_v45 = vmul.u32.u64.low %v319_v39, %v318_v41  ;;  %v589_v46 = vmul.u32.u64.high %v319_v39, %v318_v41, %v588_v45 }
  0x35   :  { %v310_v50 = vsel %vm304_vm4, %v307_v48, %v309_v49 }
  0x36   :  { %v329_v51 = vadd.s32 1, %v585_v43  ;;  %vm328_vm5 = vc.u32 %v589_v46, %v584_v42  ;;  %v326_v52 = vmul.u32 %v319_v39, %v310_v50  ;;  %v327_v28 = vadd.s32 %v584_v42, %v589_v46 }
  0x38   :  { %v330_v53 = vsel %vm328_vm5, %v329_v51, %v585_v43 }
  0x39   :  { %v331_v54 = vadd.s32 %v330_v53, %v326_v52 }
  0x3b   :  { %v332_v55 = vadd.s32 536870912, %v331_v54 }
  0x3d   :  { %v598_v57 = vshrl.u32 %v332_v55, 30 }
  0x3f   :  { %v334_v59 = vshll.u32 %v598_v57, 30 }
  0x41   :  { %v601_v61 = vsub.s32 %v331_v54, %v334_v59 }
  0x43   :  { %v337_v1 = vsub.s32 0, %v601_v61 }
  0x45   :  { %v414_v6 = vmin.u32 %v337_v1, %v601_v61 }
  0x47   :  { %v339_v11 = vclz %v414_v6 }
  0x49   :  { %v415_v16 = vadd.s32 4294967294, %v339_v11 }
  0x4b   :  { %vm416_vm7 = vcmp.lt.s32.totalorder %v415_v16, 0 }
  0x4c   :  { %v342_v25 = vsel %vm416_vm7, 0, %v415_v16  ;;  %vm363_vm7 = vweird.f32 %v558_v0 }
  0x4d   :  { %v343_v29 = vsub.s32 32, %v342_v25  ;;  %v347_v33 = vsub.s32 4294967266, %v342_v25 }
  0x4f   :  { %v348_v49 = vadd.s32 127, %v347_v33  ;;  %v357_v33 = vsub.s32 4, %v598_v57 }
  0x91   :  { %v41_v62 = vpop.permute.xlu0 %40 }
  0x95   :  { %v43_v2 = vpop.permute.xlu0 %42 }
  0x96   :  { %v612_v4 = vsel %vm603_vm6, %v41_v62, %v43_v2  ;;  %v345_v2 = vshrl.u32 %v327_v28, %v343_v29 }
  0x97   :  { %v46_v5 = vmul.f32 %v612_v4, %v612_v4 }
  0x99   :  { %v47_v7 = vadd.f32 %v46_v5, %v45_v3  ;;  %v349_v3 = vshll.u32 %v348_v49, 23 }
  0x9b   :  { %v617_v9 = vadd.f32 1e-06, %v47_v7 }
  0x9d   :  { %v56_v13 = vand.u32 2139095040, %v617_v9  ;;  %v53_v21 = vand.u32 2147483647, %v617_v9  ;;  %vm55_vm1 = vcmp.lt.s32.totalorder %v617_v9, 0 }
  0x9f   :  { %v57_v15 = vshrl.u32 %v56_v13, 23  ;;  %v60_v26 = vand.u32 8388607, %v53_v21  ;;  %v350_v13 = vor.u32 4788187, %v349_v3 }
  0xa0   :  { %vm54_vm2 = vcmp.le.f32.partialorder %v53_v21, 0.7853982 }
  0xa1   :  { %v402_v18 = vadd.s32 4294967169, %v57_v15  ;;  %v61_v42 = vor.u32 8388608, %v60_v26 }
  0xa3   :  { %v63_v20 = vadd.s32 1, %v402_v18  ;;  %v101_v52 = vshll.u32 %v61_v42, 8  ;;  %v351_v18 = vand.u32 2147483647, %v350_v13 }
  0xa5   :  { %vm64_vm8 = vcmp.gt.s32.totalorder %v63_v20, 0 }
  0xa6   :  { %v65_v23 = vsel %vm64_vm8, %v63_v20, 0 }
  0xa7   :  { %v67_v24 = vand.u32 31, %v65_v23  ;;  %v66_v30 = vshrl.u32 %v65_v23, 5 }
  0xa9   :  { %v68_v27 = vsub.s32 32, %v67_v24  ;;  %v70_v31 = vshll.u32 %v514_v17, %v67_v24  ;;  %v73_v32 = vshll.u32 %v515_v19, %v67_v24  ;;  %v76_v36 = vshll.u32 %v516_v22, %v67_v24 }
  0xaa   :  { %v79_v38 = vshll.u32 %v511_v8, %v67_v24  ;;  %v82_v40 = vshll.u32 %v512_v10, %v67_v24  ;;  %vm85_vm9 = vcmp.lt.s32.totalorder %v66_v30, 1  ;;  %vm88_vm10 = vcmp.lt.s32.totalorder %v66_v30, 4 }
  0xab   :  { %v71_v34 = vshrl.u32 %v515_v19, %v68_v27  ;;  %v74_v35 = vshrl.u32 %v516_v22, %v68_v27  ;;  %v77_v37 = vshrl.u32 %v511_v8, %v68_v27  ;;  %v80_v39 = vshrl.u32 %v512_v10, %v68_v27 }
  0xac   :  { %v83_v41 = vshrl.u32 %v513_v12, %v68_v27  ;;  %v69_v8 = vshrl.u32 %v514_v17, %v68_v27  ;;  %vm87_vm11 = vcmp.lt.s32.totalorder %v66_v30, 3  ;;  %vm86_vm12 = vcmp.lt.s32.totalorder %v66_v30, 2 }
  0xad   :  { %v72_v43 = vor.u32 %v71_v34, %v70_v31  ;;  %v75_v44 = vor.u32 %v74_v35, %v73_v32  ;;  %v78_v45 = vor.u32 %v77_v37, %v76_v36  ;;  %v81_v46 = vor.u32 %v80_v39, %v79_v38 }
  0xae   :  { %v84_v19 = vor.u32 %v83_v41, %v82_v40  ;;  %v344_v17 = vshll.u32 %v601_v61, %v342_v25  ;;  %v358_v39 = vsel %vm273_vm14, %v357_v33, %v598_v57 }
  0xaf   :  { %v90_v47 = vsel %vm88_vm10, %v78_v45, 2102212464  ;;  %v93_v22 = vsel %vm85_vm9, %v72_v43, %v75_v44  ;;  %v97_v48 = vsel %vm85_vm9, %v75_v44, %v78_v45  ;;  %v94_v50 = vsel %vm88_vm10, %v81_v46, 920167782 }
  0xb0   :  { %v98_v51 = vsel %vm88_vm10, %v84_v19, 1326507024  ;;  %v95_v10 = vsel %vm87_vm11, %v78_v45, %v94_v50  ;;  %v89_v53 = vsel %vm85_vm9, %v69_v8, %v72_v43  ;;  %v91_v54 = vsel %vm87_vm11, %v75_v44, %v90_v47 }
  0xb1   :  { %v99_v12 = vsel %vm87_vm11, %v81_v46, %v98_v51  ;;  %v96_v55 = vsel %vm86_vm12, %v93_v22, %v95_v10  ;;  %v92_v1 = vsel %vm86_vm12, %v89_v53, %v91_v54  ;;  %v346_v11 = vor.u32 %v345_v2, %v344_v17 }
  0xb2   :  { %v100_v56 = vsel %vm86_vm12, %v97_v48, %v99_v12  ;;  %v638_v60 = vmul.u32.u64.low %v101_v52, %v96_v55  ;;  %v639_v62 = vmul.u32.u64.high %v101_v52, %v96_v55, %v638_v60  ;;  %v108_v6 = vmul.u32 %v101_v52, %v92_v1 }
  0xb3   :  { %v635_v58 = vmul.u32.u64.low %v101_v52, %v100_v56  ;;  %v636_v59 = vmul.u32.u64.high %v101_v52, %v100_v56, %v635_v58  ;;  %v353_v20 = vcvt.s32.f32 %v346_v11  ;;  %v360_v44 = vsel %vm648_vm15, 0, %v358_v39 }
  0xb4   :  { %v111_v5 = vadd.s32 1, %v639_v62  ;;  %v364_v47 = vadd.s32 3, %v360_v44  ;;  %v269_v2 = vstv %s265_s1 }
  0xb5   :  { %vm110_vm13 = vc.u32 %v636_v59, %v638_v60  ;;  %v354_v26 = vmul.f32 %v353_v20, %v351_v18  ;;  %v109_v36 = vadd.s32 %v638_v60, %v636_v59 }
  0xb6   :  { %v112_v7 = vsel %vm110_vm13, %v111_v5, %v639_v62  ;;  %v365_v50 = vand.u32 3, %v364_v47  ;;  %v375_v5 = vstv %s410_s4 }
  0xb7   :  { %v113_v15 = vadd.s32 %v112_v7, %v108_v6  ;;  %v355_v25 = vxor.u32 2147483648, %v354_v26 }
  0xb8   :  { %vm367_vm3 = vcmp.eq.s32.totalorder %v365_v50, 0  ;;  %vm370_vm4 = vcmp.eq.s32.totalorder %v365_v50, 2  ;;  %vm366_vm5 = vcmp.lt.s32.totalorder %v365_v50, 2 }
  0xb9   :  { %v114_v16 = vadd.s32 536870912, %v113_v15  ;;  %v356_v31 = vsel %vm273_vm14, %v355_v25, %v354_v26  ;;  %vm145_vm14 = vweird.f32 %v617_v9 }
  0xba   :  { %v359_v34 = vsel %vm648_vm15, %v558_v0, %v356_v31 }
  0xbb   :  { %v115_v23 = vshrl.u32 %v114_v16, 30  ;;  %437 = vcosq.f32 %v359_v34 }
  0xbc   :  { %439 = vsinq.f32 %v359_v34 }
  0xbd   :  { %v116_v24 = vshll.u32 %v115_v23, 30  ;;  %441 = vrcp.f32 %v617_v9  ;;  %v139_v48 = vsub.s32 4, %v115_v23 }
  0xbf   :  { %v117_v27 = vsub.s32 %v113_v15, %v116_v24  ;;  %v140_v10 = vsel %vm55_vm1, %v139_v48, %v115_v23  ;;  %v270_v15 = vmul.f32 %v269_v2, %v558_v0 }
  0xc0   :  { %v142_v55 = vsel %vm54_vm2, 0, %v140_v10 }
  0xc1   :  { %v119_v61 = vsub.s32 0, %v117_v27  ;;  %v146_v21 = vadd.s32 3, %v142_v55  ;;  %v250_v17 = vand.u32 3, %v142_v55 }
  0xc3   :  { %v403_v28 = vmin.u32 %v119_v61, %v117_v27  ;;  %v147_v1 = vand.u32 3, %v146_v21  ;;  %vm255_vm9 = vcmp.eq.s32.totalorder %v250_v17, 2  ;;  %vm252_vm11 = vcmp.eq.s32.totalorder %v250_v17, 0 }
  0xc4   :  { %vm251_vm13 = vcmp.lt.s32.totalorder %v250_v17, 2 }
  0xc5   :  { %v121_v29 = vclz %v403_v28  ;;  %v438_v49 = vpop.eup %437  ;;  %vm152_vm8 = vcmp.eq.s32.totalorder %v147_v1, 2  ;;  %vm149_vm10 = vcmp.eq.s32.totalorder %v147_v1, 0  ;;  %vm148_vm12 = vcmp.lt.s32.totalorder %v147_v1, 2 }
  0xc6   :  { %v440_v57 = vpop.eup %439  ;;  %v371_v53 = vxor.u32 2147483648, %v438_v49  ;;  %v517_v28 = vmov 1.0  }
  0xc7   :  { %v404_v32 = vadd.s32 4294967294, %v121_v29  ;;  %v368_v52 = vxor.u32 2147483648, %v440_v57  ;;  %v442_v54 = vpop.eup %441  ;;  %v260_v29 = vsel %vm603_vm6, -1.0, %v517_v28 }
  0xc8   :  { %v50_v56 = vmul.f32 %v442_v54, %v617_v9  ;;  %v372_v59 = vsel %vm370_vm4, %v371_v53, %v440_v57 }
  0xc9   :  { %vm405_vm0 = vcmp.lt.s32.totalorder %v404_v32, 0  ;;  %v369_v58 = vsel %vm367_vm3, %v438_v49, %v368_v52 }
  0xca   :  { %v124_v35 = vsel %vm405_vm0, 0, %v404_v32  ;;  %v373_v60 = vsel %vm366_vm5, %v369_v58, %v372_v59  ;;  %v51_v62 = vsub.f32 2.0, %v50_v56  ;;  %v379_v32 = vstv %s667_s5 }
  0xcb   :  { %v125_v37 = vsub.s32 32, %v124_v35  ;;  %v129_v38 = vsub.s32 4294967266, %v124_v35  ;;  %v126_v14 = vshll.u32 %v117_v27, %v124_v35  ;;  %v374_v3 = vsel %vm363_vm7, nan, %v373_v60 }
  0xcc   :  { %v52_v13 = vmul.f32 %v442_v54, %v51_v62  ;;  %v376_v18 = vmul.f32 %v375_v5, %v374_v3 }
  0xcd   :  { %v127_v40 = vshrl.u32 %v109_v36, %v125_v37  ;;  %v130_v41 = vadd.s32 127, %v129_v38  ;;  %v382_v38 = vstv %s412_s6 }
  0xce   :  { %v378_v25 = vmul.f32 %v52_v13, %v558_v0  ;;  %v377_v36 = vadd.f32 %v376_v18, %v270_v15 }
  0xcf   :  { %v128_v42 = vor.u32 %v127_v40, %v126_v14  ;;  %v131_v43 = vshll.u32 %v130_v41, 23 }
  0xd0   :  { %v380_v37 = vmul.f32 %v379_v32, %v378_v25 }
  0xd1   :  { %v132_v45 = vor.u32 4788187, %v131_v43  ;;  %v135_v19 = vcvt.s32.f32 %v128_v42 }
  0xd2   :  { %v381_v39 = vadd.f32 %v380_v37, %v377_v36 }
  0xd3   :  { %v133_v46 = vand.u32 2147483647, %v132_v45 }
  0xd5   :  { %v136_v22 = vmul.f32 %v135_v19, %v133_v46 }
  0xd7   :  { %v137_v8 = vxor.u32 2147483648, %v136_v22 }
  0xd9   :  { %v138_v51 = vsel %vm55_vm1, %v137_v8, %v136_v22 }
  0xda   :  { %v141_v12 = vsel %vm54_vm2, %v617_v9, %v138_v51 }
  0xdb   :  { %443 = vcosq.f32 %v141_v12 }
  0xdc   :  { %445 = vsinq.f32 %v141_v12 }
  0xe5   :  { %v444_v6 = vpop.eup %443 }
  0xe6   :  { %v446_v7 = vpop.eup %445  ;;  %v153_v11 = vxor.u32 2147483648, %v444_v6 }
  0xe7   :  { %v150_v16 = vxor.u32 2147483648, %v446_v7 }
  0xe8   :  { %v154_v20 = vsel %vm152_vm8, %v153_v11, %v446_v7  ;;  %v257_v23 = vsel %vm255_vm9, %v153_v11, %v446_v7 }
  0xe9   :  { %v151_v24 = vsel %vm149_vm10, %v444_v6, %v150_v16  ;;  %v254_v26 = vsel %vm252_vm11, %v444_v6, %v150_v16 }
  0xea   :  { %v155_v27 = vsel %vm148_vm12, %v151_v24, %v154_v20  ;;  %v258_v61 = vsel %vm251_vm13, %v254_v26, %v257_v23 }
  0xeb   :  { %v156_v30 = vsel %vm145_vm14, nan, %v155_v27  ;;  %v259_v31 = vsel %vm145_vm14, nan, %v258_v61 }
  0xec   :  { %v262_v33 = vmul.f32 %v259_v31, %v612_v4  ;;  %v261_v34 = vmul.f32 %v156_v30, %v558_v0 }
  0xee   :  { %v263_v35 = vmul.f32 %v262_v33, %v260_v29 }
  0xf0   :  { %v264_v9 = vadd.f32 %v263_v35, %v261_v34 }
  0xf2   :  { %v383_v14 = vmul.f32 %v382_v38, %v264_v9 }
  0xf4   :  { %v384_v40 = vadd.f32 %v383_v14, %v381_v39 }
  0xf6   :  { %385 = vst [vmem:[#allocation7] sm:$0xff] %v384_v40 }
  0xf7   :  { %490 = shalt.err (!%p487_p1)
}
  0xf8   :  { %s491_s12 = scalar_lea.hbm %s691_s2, 128 }
  0xf9   :  { %p492_p2 = scmp.ne.s32.totalorder %s691_s2, %s491_s12  ;;  %p495_p3 = scmp.lt.u32.totalorder %s491_s12, %s691_s2 }
  0xfb   :  { %p497_p4 = pnand %p495_p3, %p492_p2 }
  0xfd   :  { %500 = shalt.err (!%p497_p4)
}
  0xfe   :  { %395 = dma.vmem_to_hbm [thread:$0]  %s393_s8, 128, %s691_s2, [#allocation4]  }
  0xff   :  { %505 = dma.done.wait [#allocation4], 128  }
 0x100   :  { %506 = vsyncadd [#allocation4], 4294967168 }
 0x101   :  { %399 = vsyncpa [#allocation3], 1 }
 0x102   :  { %400 = vsyncpa [#allocation4], 1 }
 0x103   :  { %401 = vsyncpa [#allocation5], 1 }

</bundles_post_ra>
